<compile_context>
chip_gen: v5e
topology: v5e:2x2
jax: 0.10.0
libtpu: 0.0.40
codegen_flags: <defaults>
</compile_context>

<pallas_src>
import functools

import jax
import jax.numpy as jnp
from jax import lax
from jax.experimental import pallas as pl
from jax.experimental.pallas import tpu as pltpu


# ------------------------------ power helpers ------------------------------

def _int_pow(x, n: int):
    """x**n for integer n >= 1 via exponentiation-by-squaring (VPU only)."""
    assert n >= 1
    result = None
    base = x
    while n:
        if n & 1:
            result = base if result is None else result * base
        n >>= 1
        if n:
            base = base * base
    return result


def _is_cheap(q: float) -> bool:
    """q>0 computable with VPU multiplies plus at most one (shared) sqrt."""
    return q > 0.0 and (2.0 * q).is_integer() and q <= 8.0


def _is_half(q: float) -> bool:
    return int(round(2.0 * q)) % 2 == 1


def _cheap_pow(a, sqrt_a, q: float):
    """a**q for cheap q (integer / half-integer in (0, 8])."""
    n2 = int(round(2.0 * q))
    ip = _int_pow(a, n2 // 2) if n2 >= 2 else None
    if n2 % 2:
        return sqrt_a if ip is None else ip * sqrt_a
    return ip


def _snap_half(v: float) -> float:
    r = round(v * 2.0) / 2.0
    return r if abs(v - r) < 1e-9 else v


def _make_power_plan(qs):
    """Static, EUP-minimizing plan for |x|**q over all q>0 in qs."""
    uniq = sorted({float(q) for q in qs if q > 0.0})
    cheap = [q for q in uniq if _is_cheap(q)]
    generic = [q for q in uniq if not _is_cheap(q)]
    base = generic[0] if generic else None
    derived = {}                      # q -> dq  with |x|^q = |x|^base * |x|^dq
    exped = []
    for q in generic[1:]:
        dq = _snap_half(q - base)
        if _is_cheap(dq):
            derived[q] = dq
        else:
            exped.append(q)
    need_sqrt = any(_is_half(q) for q in cheap) or \
                any(_is_half(dq) for dq in derived.values())
    need_log = base is not None
    return dict(cheap=cheap, base=base, exped=exped, derived=derived,
                need_sqrt=need_sqrt, need_log=need_log)


def _all_powers(a, plan):
    """dict q -> |a|**q for every positive q in the plan, sharing EUP work."""
    sqrt_a = jnp.sqrt(a) if plan["need_sqrt"] else None
    log_a = jnp.log(a) if plan["need_log"] else None
    out = {}
    for q in plan["cheap"]:
        out[q] = _cheap_pow(a, sqrt_a, q)
    base = plan["base"]
    if base is not None:
        # a == 0 (masked lanes): exp(base * log 0) = exp(-inf) = 0, as required.
        out[base] = jnp.exp(jnp.float32(base) * log_a)
    for q in plan["exped"]:
        out[q] = jnp.exp(jnp.float32(q) * log_a)
    for q, dq in plan["derived"].items():
        out[q] = out[base] * _cheap_pow(a, sqrt_a, dq)
    return out


# --------------------------------- kernel ----------------------------------

def _scat_kernel(x_ref, o_ref, acc_ref, *, qs, lead, w_len):
    """Accumulate lane-dense partial sums of |x|^q over time blocks.

    x_ref  : (tm, tt)      input block (rows on sublanes, time on lanes)
    o_ref  : (tm, Q)       per-row moments (written once at finalize)
    acc_ref: (tm, Q*128)   f32 lane-dense running sums, persistent across t axis

    Valid time positions (window-fused coordinates) are [lead, lead + w_len)
    relative to block 0; everything outside is masked to 0 before the power.
    """
    tm_blk, tt = x_ref.shape
    t = pl.program_id(1)
    nt = pl.num_programs(1)

    @pl.when(t == 0)
    def _init():
        acc_ref[...] = jnp.zeros_like(acc_ref)

    active = [k for k, q in enumerate(qs) if q != 0.0]
    plan = _make_power_plan([qs[k] for k in active])
    n_full, rem = divmod(tt, 128)
    need_low = lead > 0                       # leading lanes of the fused window
    need_high = (lead + w_len) % tt != 0      # ragged tail block / window end

    if need_low or need_high:
        lane = lax.broadcasted_iota(jnp.int32, (tm_blk, 128), 1)
        base_off = t * tt                     # traced scalar

    def masked_abs(c0, cw):
        # Direct VMEM load of a 128-lane-aligned static slice; masked lanes are
        # where-selected to 0 (NOT multiplied) so garbage NaN/Inf cannot leak.
        a = jnp.abs(x_ref[:, c0:c0 + cw].astype(jnp.float32))
        if need_low or need_high:
            ln = lane[:, :cw]
            ok = None
            if need_low:
                ok = ln >= (lead - base_off - c0)
            if need_high:
                hi = ln < (lead + w_len - base_off - c0)
                ok = hi if ok is None else ok & hi
            a = jnp.where(ok, a, jnp.float32(0.0))
        return a
        # TODO(synk): optional bf16 compute path for bf16 inputs on v6e/v7x
        # (keep abs/int-powers in bf16, upcast at the add) if tolerance allows.

    if active:
        # Full 128-lane chunks: per-q partial sums kept as values, then one
        # unmasked (tm, 128) RMW into the scratch per q per grid step.
        if n_full:
            parts = {}
            for c in range(n_full):
                pw = _all_powers(masked_abs(c * 128, 128), plan)
                for k in active:
                    p = pw[float(qs[k])]
                    parts[k] = p if c == 0 else parts[k] + p
            for k in active:
                acc_ref[:, k * 128:(k + 1) * 128] += parts[k]
        # Tail chunk narrower than 128 lanes (only when tt equals the full time
        # extent, i.e. a single grid step -> happens once per row block).
        if rem:
            pw = _all_powers(masked_abs(n_full * 128, rem), plan)
            for k in active:
                acc_ref[:, k * 128:k * 128 + rem] += pw[float(qs[k])]

    @pl.when(t == nt - 1)
    def _finalize():
        inv = jnp.float32(1.0 / w_len)        # mean over the true window length
        cols = []
        for k, q in enumerate(qs):
            if q == 0.0:                      # |x|**0 == 1 exactly
                cols.append(jnp.ones((tm_blk, 1), jnp.float32))
            else:
                s = jnp.sum(acc_ref[:, k * 128:(k + 1) * 128],
                            axis=-1, keepdims=True)
                cols.append(s * inv)
        o_ref[...] = jnp.concatenate(cols, axis=-1).astype(o_ref.dtype)


# --------------------------------- wrapper ----------------------------------

def _round_up(x: int, m: int) -> int:
    return ((x + m - 1) // m) * m


def scattering_coefficients(x, qs, window=None, *, tm=None, tt=None):
    """JAX/Pallas equivalent of ScatteringCoefficients(qs, TimeAverage(window)).

    x: (B, N, js, A, T) float array (f32 or bf16)
    qs: sequence of non-negative float exponents
    window: optional iterable of int time indices (TimeAverage window)
    returns: (B, N, js, A, len(qs), 1) float32
    """
    qs = tuple(float(q) for q in qs)
    if any(q < 0.0 for q in qs):
        raise ValueError("scattering_coefficients requires q >= 0")
    Q = len(qs)

    B, N, J, A, T = x.shape
    M = B * N * J * A

    # ---- TimeAverage window handling ----
    t_start, w_len = 0, T
    if window is not None:
        w = [int(i) for i in window]
        if not w:
            raise ValueError("empty TimeAverage window")
        contiguous = all(w[i + 1] - w[i] == 1 for i in range(len(w) - 1))
        if contiguous:
            # Fused into the kernel: block-offset index_map + in-kernel lane mask.
            t_start, w_len = w[0], len(w)
        else:
            # TODO(synk): fuse arbitrary/strided windows (scalar-prefetched index
            # table or pl.ANY + make_async_copy gather) to drop this HBM pass.
            x = jnp.take(x, jnp.asarray(w, dtype=jnp.int32), axis=-1)
            T = w_len = len(w)

    xf = x.reshape(M, T)

    # ---- tile selection ----
    if tm is None:
        # Big enough to amortize the ~600-cycle grid-step overhead, small enough
        # that the "parallel" row axis has several blocks (v7x megacore).
        tm = max(8, min(512, _round_up(pl.cdiv(M, 8), 8)))
    else:
        tm = max(8, _round_up(int(tm), 8))

    if tt is None:
        tt = min(4096, _round_up(w_len, 128))
    else:
        tt = max(1, int(tt))
    if tt >= T:
        tt = T                                # full time extent: always legal
    elif tt % 128:
        tt = min(T, _round_up(tt, 128))       # lane-aligned time blocks

    t_blk_off = t_start // tt                 # whole-block offset for the window
    lead = t_start - t_blk_off * tt           # leading invalid lanes in block 0
    nt = pl.cdiv(lead + w_len, tt)

    kernel = functools.partial(_scat_kernel, qs=qs, lead=lead, w_len=w_len)

    out = pl.pallas_call(
        kernel,
        out_shape=jax.ShapeDtypeStruct((M, Q), jnp.float32),
        grid_spec=pltpu.PrefetchScalarGridSpec(
            num_scalar_prefetch=0,
            grid=(pl.cdiv(M, tm), nt),        # rows parallel, time = reduction
            in_specs=[pl.BlockSpec((tm, tt), lambda i, t: (i, t + t_blk_off))],
            out_specs=pl.BlockSpec((tm, Q), lambda i, t: (i, 0)),
            scratch_shapes=[pltpu.VMEM((tm, Q * 128), jnp.float32)],
        ),
        compiler_params=pltpu.CompilerParams(
            dimension_semantics=("parallel", "arbitrary"),
            vmem_limit_bytes=48 * 1024 * 1024,   # safe on v5e/v6e (128 MiB) and v7x (64 MiB)
        ),
    )(xf)

    return out.reshape(B, N, J, A, Q, 1)


# -------------------------------- reference ---------------------------------

def _reference(x, qs, window=None):
    """Pure-JAX reference matching the PyTorch module semantics."""
    qs = jnp.asarray(qs, dtype=jnp.float32)
    if window is not None:
        x = jnp.take(x, jnp.asarray(window, dtype=jnp.int32), axis=-1)
    y = jnp.abs(x)[..., None, :] ** qs[:, None]            # B,N,js,A,Q,T
    return jnp.mean(y, axis=-1, keepdims=True)             # B,N,js,A,Q,1


if __name__ == "__main__":
    key = jax.random.PRNGKey(0)
    k1, k2, k3 = jax.random.split(key, 3)

    # --- test 1: basic shapes, single full-width time block, shared sqrt path ---
    B, N, J, A, T = 2, 4, 3, 2, 16
    qs = [0.5, 1.0, 2.0]
    x = jax.random.normal(k1, (B, N, J, A, T), dtype=jnp.float32)
    out = jax.block_until_ready(scattering_coefficients(x, qs))
    ref = _reference(x, qs)
    assert out.shape == (B, N, J, A, len(qs), 1), out.shape
    assert jnp.allclose(out, ref, rtol=1e-4, atol=1e-5), \
        float(jnp.max(jnp.abs(out - ref)))

    # --- test 2: strided (non-contiguous) window -> gather fallback, forced small
    #     time tile (multi-block accumulation, ragged rows + ragged time tail,
    #     exact q==0 path, half-integer q) ---
    B2, N2, J2, A2, T2 = 1, 3, 2, 2, 300
    qs2 = [0.0, 1.0, 2.5]
    window2 = list(range(0, T2, 2))                         # 150 time indices
    x2 = jax.random.normal(k2, (B2, N2, J2, A2, T2), dtype=jnp.float32)
    out2 = jax.block_until_ready(
        scattering_coefficients(x2, qs2, window=window2, tt=128))
    ref2 = _reference(x2, qs2, window=window2)
    assert out2.shape == (B2, N2, J2, A2, len(qs2), 1), out2.shape
    assert jnp.allclose(out2, ref2, rtol=1e-4, atol=1e-5), \
        float(jnp.max(jnp.abs(out2 - ref2)))

    # --- test 3: contiguous unaligned window fused into the kernel (zero extra
    #     HBM pass, two-sided lane mask) + generic exponents sharing one log
    #     with one derived power ---
    B3, N3, J3, A3, T3 = 2, 2, 2, 2, 512
    qs3 = [0.7, 1.7, 3.0]
    window3 = list(range(37, 37 + 200))
    x3 = jax.random.normal(k3, (B3, N3, J3, A3, T3), dtype=jnp.float32)
    out3 = jax.block_until_ready(
        scattering_coefficients(x3, qs3, window=window3))
    ref3 = _reference(x3, qs3, window=window3)
    assert out3.shape == (B3, N3, J3, A3, len(qs3), 1), out3.shape
    assert jnp.allclose(out3, ref3, rtol=1e-4, atol=1e-5), \
        float(jnp.max(jnp.abs(out3 - ref3)))

    print("KERNEL_OK")
</pallas_src>

<mosaic_0001>
module attributes {stable_mosaic.version = 11 : i64} {
  func.func @_scat_kernel(%arg0: i32, %arg1: i32, %arg2: memref<8x16xf32, #tpu.memory_space<vmem>>, %arg3: memref<8x3xf32, #tpu.memory_space<vmem>>, %arg4: memref<8x384xf32, #tpu.memory_space<vmem>>) attributes {dimension_semantics = [#tpu.dimension_semantics<parallel>, #tpu.dimension_semantics<arbitrary>], iteration_bounds = array<i64: 6, 1>, scalar_prefetch = 0 : i64, scratch_operands = 1 : i64, tpu.core_type = #tpu.core_type<tc>, window_params = [{transform_indices = @transform_0, window_bounds = array<i64: 8, 16>}, {transform_indices = @transform_1, window_bounds = array<i64: 8, 3>}]} {
    %c0_i32 = arith.constant 0 : i32
    %0 = arith.cmpi eq, %arg1, %c0_i32 : i32
    %1 = arith.extui %0 : i1 to i32
    %c0_i32_0 = arith.constant 0 : i32
    %2 = arith.cmpi ne, %1, %c0_i32_0 : i32
    scf.if %2 {
      %cst = arith.constant 0.000000e+00 : f32
      %19 = vector.broadcast %cst : f32 to vector<8x384xf32>
      %c0_14 = arith.constant 0 : index
      %c0_15 = arith.constant 0 : index
      %20 = vector.load %arg4[%c0_14, %c0_15] : memref<8x384xf32, #tpu.memory_space<vmem>>, vector<8x384xf32>
      tpu.vector_store %arg4[%c0_14, %c0_15], %19 {strides = array<i32>} : memref<8x384xf32, #tpu.memory_space<vmem>>, vector<8x384xf32>,
    } else {
    }
    %c0 = arith.constant 0 : index
    %c0_1 = arith.constant 0 : index
    %3 = vector.load %arg2[%c0, %c0_1] : memref<8x16xf32, #tpu.memory_space<vmem>>, vector<8x16xf32>
    %4 = math.absf %3 : vector<8x16xf32>
    %5 = math.sqrt %4 : vector<8x16xf32>
    %6 = arith.mulf %4, %4 : vector<8x16xf32>
    %c0_2 = arith.constant 0 : index
    %c0_3 = arith.constant 0 : index
    %7 = vector.load %arg4[%c0_2, %c0_3] : memref<8x384xf32, #tpu.memory_space<vmem>>, vector<8x16xf32>
    %8 = arith.addf %7, %5 : vector<8x16xf32>
    %c0_4 = arith.constant 0 : index
    %c0_5 = arith.constant 0 : index
    %9 = vector.load %arg4[%c0_4, %c0_5] : memref<8x384xf32, #tpu.memory_space<vmem>>, vector<8x16xf32>
    tpu.vector_store %arg4[%c0_4, %c0_5], %8 {strides = array<i32>} : memref<8x384xf32, #tpu.memory_space<vmem>>, vector<8x16xf32>,
    %c0_6 = arith.constant 0 : index
    %c128 = arith.constant 128 : index
    %10 = vector.load %arg4[%c0_6, %c128] : memref<8x384xf32, #tpu.memory_space<vmem>>, vector<8x16xf32>
    %11 = arith.addf %10, %4 : vector<8x16xf32>
    %c0_7 = arith.constant 0 : index
    %c128_8 = arith.constant 128 : index
    %12 = vector.load %arg4[%c0_7, %c128_8] : memref<8x384xf32, #tpu.memory_space<vmem>>, vector<8x16xf32>
    tpu.vector_store %arg4[%c0_7, %c128_8], %11 {strides = array<i32>} : memref<8x384xf32, #tpu.memory_space<vmem>>, vector<8x16xf32>,
    %c0_9 = arith.constant 0 : index
    %c256 = arith.constant 256 : index
    %13 = vector.load %arg4[%c0_9, %c256] : memref<8x384xf32, #tpu.memory_space<vmem>>, vector<8x16xf32>
    %14 = arith.addf %13, %6 : vector<8x16xf32>
    %c0_10 = arith.constant 0 : index
    %c256_11 = arith.constant 256 : index
    %15 = vector.load %arg4[%c0_10, %c256_11] : memref<8x384xf32, #tpu.memory_space<vmem>>, vector<8x16xf32>
    tpu.vector_store %arg4[%c0_10, %c256_11], %14 {strides = array<i32>} : memref<8x384xf32, #tpu.memory_space<vmem>>, vector<8x16xf32>,
    %c0_i32_12 = arith.constant 0 : i32
    %16 = arith.cmpi eq, %arg1, %c0_i32_12 : i32
    %17 = arith.extui %16 : i1 to i32
    %c0_i32_13 = arith.constant 0 : i32
    %18 = arith.cmpi ne, %17, %c0_i32_13 : i32
    scf.if %18 {
      %c0_14 = arith.constant 0 : index
      %c0_15 = arith.constant 0 : index
      %19 = vector.load %arg4[%c0_14, %c0_15] : memref<8x384xf32, #tpu.memory_space<vmem>>, vector<8x128xf32>
      %cst = arith.constant dense<0.000000e+00> : vector<8xf32>
      %20 = vector.multi_reduction <add>, %19, %cst [1] : vector<8x128xf32> to vector<8xf32>
      %21 = vector.shape_cast %20 : vector<8xf32> to vector<8x1xf32>
      %cst_16 = arith.constant 6.250000e-02 : f32
      %22 = vector.broadcast %cst_16 : f32 to vector<8x1xf32>
      %23 = arith.mulf %21, %22 : vector<8x1xf32>
      %c0_17 = arith.constant 0 : index
      %c128_18 = arith.constant 128 : index
      %24 = vector.load %arg4[%c0_17, %c128_18] : memref<8x384xf32, #tpu.memory_space<vmem>>, vector<8x128xf32>
      %cst_19 = arith.constant dense<0.000000e+00> : vector<8xf32>
      %25 = vector.multi_reduction <add>, %24, %cst_19 [1] : vector<8x128xf32> to vector<8xf32>
      %26 = vector.shape_cast %25 : vector<8xf32> to vector<8x1xf32>
      %cst_20 = arith.constant 6.250000e-02 : f32
      %27 = vector.broadcast %cst_20 : f32 to vector<8x1xf32>
      %28 = arith.mulf %26, %27 : vector<8x1xf32>
      %c0_21 = arith.constant 0 : index
      %c256_22 = arith.constant 256 : index
      %29 = vector.load %arg4[%c0_21, %c256_22] : memref<8x384xf32, #tpu.memory_space<vmem>>, vector<8x128xf32>
      %cst_23 = arith.constant dense<0.000000e+00> : vector<8xf32>
      %30 = vector.multi_reduction <add>, %29, %cst_23 [1] : vector<8x128xf32> to vector<8xf32>
      %31 = vector.shape_cast %30 : vector<8xf32> to vector<8x1xf32>
      %cst_24 = arith.constant 6.250000e-02 : f32
      %32 = vector.broadcast %cst_24 : f32 to vector<8x1xf32>
      %33 = arith.mulf %31, %32 : vector<8x1xf32>
      %34 = tpu.concatenate %23, %28, %33 in 1 : vector<8x1xf32>, vector<8x1xf32>, vector<8x1xf32> -> vector<8x3xf32>
      %c0_25 = arith.constant 0 : index
      %c0_26 = arith.constant 0 : index
      %35 = vector.load %arg3[%c0_25, %c0_26] : memref<8x3xf32, #tpu.memory_space<vmem>>, vector<8x3xf32>
      tpu.vector_store %arg3[%c0_25, %c0_26], %34 {strides = array<i32>} : memref<8x3xf32, #tpu.memory_space<vmem>>, vector<8x3xf32>,
    } else {
    }
    return
  }
  func.func @transform_0(%arg0: i32, %arg1: i32) -> (i32, i32) {
    %c0_i32 = arith.constant 0 : i32
    %0 = arith.addi %arg1, %c0_i32 : i32
    %c0_i32_0 = arith.constant 0 : i32
    return %arg0, %0 : i32, i32
  }
  func.func @transform_1(%arg0: i32, %arg1: i32) -> (i32, i32) {
    %c0_i32 = arith.constant 0 : i32
    %c0_i32_0 = arith.constant 0 : i32
    return %arg0, %c0_i32 : i32, i32
  }
}

</mosaic_0001>

<bundles_post_ra>
// kernel: tpu_custom_call.1
= control target key start
LH: loop header
LB: loop body
LE: loop exit
PB: predicated region body
PF: predicated region fallthrough
CT: control target
= control target key end

     0   :  { %s323_s6 = smov 0   ;;  %s325_s7 = smov 0   ;;  %s366_s0 = inlined_call_operand.vmem [shape: f32[48,16], index: 0, kind: input, shape index: {}]   ;;  %s367_s1 = inlined_call_operand.vmem [shape: f32[48,3], index: 1, kind: output, shape index: {}]  }
   0x1   :  { %s327_s8 = smov 0  }
   0x2 LB: > { %s23_s9 = sadd.s32 1, %s306_s7  ;;  %p256_p0 = scmp.ge.s32.totalorder %s310_s8, 1  ;;  %s310_s8 = sphi %s327_s8, %s11_s8   ;;  %s306_s7 = sphi %s325_s7, %s369_s7   ;;  %s302_s6 = sphi %s323_s6, %s368_s6  }
   0x3   : > { %p25_p1 = scmp.ge.s32.totalorder %s23_s9, 6  ;;  %p103_p2 = scmp.lt.s32.totalorder %s310_s8, 7 }
   0x5   : > { %s371_s9 = smov (%p25_p1, %s23_s9), 0  ;;  %p104_p3 = pnand %p256_p0, %p103_p2 }
   0x6   : > { %p124_p4 = scmp.lt.s32.totalorder (!%p104_p3), %s302_s6, 5 }
   0x7   : > { %107 = sbr.rel (%p104_p3) target bundleno = 176 (0xb0), region = 24 }
   0xc   : > { %v312_v0 = vmov 0.0   ;;  %s373_s6 = smov (!%p124_p4, %s302_s6), 5  ;;  %vm159_vm0 = vcmask 130048   ;;  %vm182_vm3 = vcmask 7168   ;;  %vm184_vm4 = vcmask 15360  }
   0xd   : > { %139 = vst [vmem:[#allocation2] sm:$0xff] %v312_v0  ;;  %s257_s10 = sshll.u32 %s373_s6, 3  ;;  %vm186_vm5 = vcmask 23552  }
   0xe   : > { %140 = vst [vmem:[#allocation2 + $0x8] sm:$0xff] %v312_v0  ;;  %s130_s13 = scalar_lea.vmem %s366_s0, %s257_s10  ;;  %s134_s16 = scalar_lea.vmem %s367_s1, %s257_s10 }
   0xf   : > { %141 = vst [vmem:[#allocation2 + $0x10] sm:$0xff] %v312_v0  ;;  %v142_v1 = vld [vmem:[%s130_s13] sm:$0xff] }
  0x10   : > { %v143_v2 = vand.u32 2147483647, %v142_v1 }
  0x12   : > { %286 = vrsqrt.f32 %v143_v2  ;;  %v156_v3 = vmul.f32 %v143_v2, %v143_v2  ;;  %163 = vst.msk [vmem:[#allocation2 + $0x8] sm:$0xff] %vm159_vm0, %v143_v2  ;;  %vm151_vm1 = vcmp.eq.f32.partialorder %v143_v2, inf  ;;  %v154_v11 = vand.u32 2147483648, %v143_v2 }
  0x13   : > { %vm153_vm2 = vcmp.eq.f32.partialorder %v143_v2, 0.0 }
  0x14   : > { %166 = vst.msk [vmem:[#allocation2 + $0x10] sm:$0xff] %vm159_vm0, %v156_v3 }
  0x18   : > { %v287_v4 = vpop.eup %286 }
  0x19   : > { %v145_v5 = vmul.f32 %v287_v4, %v143_v2  ;;  %v174_v16 = vld [vmem:[#allocation2 + $0x8] sm:$0xff] }
  0x1b   : > { %v146_v6 = vmul.f32 %v287_v4, %v145_v5  ;;  %v178_v8 = vld [vmem:[#allocation2 + $0x10] sm:$0xff] }
  0x1c   : > { %179 = vadd.xlane.f32.xlu1 %v178_v8 }
  0x1d   : > { %v147_v7 = vmul.f32 0.5, %v146_v6 }
  0x1f   : > { %v148_v9 = vsub.f32 1.5, %v147_v7 }
  0x21   : > { %v149_v10 = vmul.f32 %v287_v4, %v148_v9 }
  0x23   : > { %v150_v12 = vmul.f32 %v149_v10, %v143_v2 }
  0x25   : > { %v152_v13 = vsel %vm151_vm1, %v143_v2, %v150_v12 }
  0x26   : > { %v155_v14 = vsel %vm153_vm2, %v154_v11, %v152_v13 }
  0x27   : > { %160 = vst.msk [vmem:[#allocation2] sm:$0xff] %vm159_vm0, %v155_v14 }
  0x2e   : > { %v170_v15 = vld [vmem:[#allocation2] sm:$0xff] }
  0x2f   : > { %171 = vadd.xlane.f32.xlu0 %v170_v15 }
  0x37   : > { %175 = vadd.xlane.f32.xlu0 %v174_v16 }
  0x8f   : > { %v180_v18 = vpop.xlane.xlu1 %179 }
  0x90   : > { %v181_v20 = vmul.f32 0.0625, %v180_v18 }
  0xa2   : > { %v172_v17 = vpop.xlane.xlu0 %171 }
  0xa3   : > { %v173_v21 = vmul.f32 0.0625, %v172_v17 }
  0xaa   : > { %v176_v19 = vpop.xlane.xlu0 %175 }
  0xab   : > { %v177_v22 = vmul.f32 0.0625, %v176_v19 }
  0xad   : > { %v183_v23 = vsel %vm182_vm3, %v173_v21, %v177_v22 }
  0xae   : > { %v185_v24 = vsel %vm184_vm4, %v183_v23, %v181_v20 }
  0xaf   : > { %187 = vst.msk [vmem:[%s134_s16] sm:$0xff] %vm186_vm5, %v185_v24 }
  0xb0 PF: > { %s11_s8 = sadd.s32 1, %s310_s8   ;;  %s368_s6 = smov %s306_s7 }
  0xb1   : > { %p8_p5 = scmp.ge.s32.totalorder %s11_s8, 8   ;;  %s369_s7 = smov %s371_s9 }
  0xb3   :  { %10 = sbr.rel (!%p8_p5) target bundleno = 2 (0x2), region = 62 }

</bundles_post_ra>
